<compile_context>
chip_gen: v7x
topology: tpu7x:2x2x1
jax: 0.10.0
libtpu: 0.0.40
codegen_flags: <defaults>
</compile_context>

<pallas_src>
import math

import jax
import jax.numpy as jnp
from jax.experimental import pallas as pl
from jax.experimental.pallas import tpu as pltpu


def _cdiv(a, b):
    return -(-a // b)


def _round_up(a, m):
    return _cdiv(a, m) * m


def _dice_partials_kernel(x_ref, t_ref, out_ref, acc_t, acc_x, acc_i, acc_c):
    s = pl.program_id(1)

    @pl.when(s == 0)
    def _init():
        acc_t[...] = jnp.zeros_like(acc_t)
        acc_x[...] = jnp.zeros_like(acc_x)
        acc_i[...] = jnp.zeros_like(acc_i)
        acc_c[...] = jnp.zeros_like(acc_c)

    x = x_ref[...]          # (tm, tn), input dtype
    t = t_ref[...]          # (tm, tn), input dtype

    t_nz = (t != 0).astype(jnp.float32)
    x_nz = (x != 0).astype(jnp.float32)
    x_n1 = (x != 1).astype(jnp.float32)

    # Hot loop: VPU-only elementwise accumulation (no per-step cross-lane
    # reduce, no scalar read-modify-write).  The pass is HBM-bound; this
    # VMEM/VALU work hides under the input DMA on v5e/v6e/v7x.
    acc_t[...] += t_nz
    acc_x[...] += x_nz
    acc_i[...] += t_nz * x_nz
    acc_c[...] += x_n1

    @pl.when(s == pl.num_programs(1) - 1)
    def _finalize():
        # One sublane (XLU) reduce per accumulator, once per split.  The lane
        # reduce is finished cheaply in the wrapper.
        out_ref[:, pl.ds(0, 1), :] = jnp.sum(acc_t[...], axis=0, keepdims=True)[None]
        out_ref[:, pl.ds(1, 1), :] = jnp.sum(acc_x[...], axis=0, keepdims=True)[None]
        out_ref[:, pl.ds(2, 1), :] = jnp.sum(acc_i[...], axis=0, keepdims=True)[None]
        out_ref[:, pl.ds(3, 1), :] = jnp.sum(acc_c[...], axis=0, keepdims=True)[None]


def dice_coeff(logits, target, *, lane_tile=512, max_row_tile=512, splits=2):
    """Pallas implementation of DiceCoeff.forward (binary dice coefficient)."""
    assert logits.shape == target.shape, (logits.shape, target.shape)
    n = math.prod(logits.shape)

    x = jnp.ravel(logits)
    t = jnp.ravel(target)

    tn = lane_tile                                   # lanes, multiple of 128
    rows = max(1, _cdiv(n, tn))
    tm = min(max_row_tile, _round_up(rows, 8))       # sublane rows per block
    blocks = _round_up(max(1, _cdiv(rows, tm)), splits)
    rows_pad = blocks * tm
    pad = rows_pad * tn - n                          # zero padding (static)
    if pad:
        x = jnp.pad(x, (0, pad))
        t = jnp.pad(t, (0, pad))
    x2 = x.reshape(rows_pad, tn)
    t2 = t.reshape(rows_pad, tn)
    steps = blocks // splits

    partials = pl.pallas_call(
        _dice_partials_kernel,
        out_shape=jax.ShapeDtypeStruct((splits, 4, tn), jnp.float32),
        grid_spec=pltpu.PrefetchScalarGridSpec(
            num_scalar_prefetch=0,
            grid=(splits, steps),
            in_specs=[
                pl.BlockSpec((tm, tn), lambda p, s: (p * steps + s, 0)),
                pl.BlockSpec((tm, tn), lambda p, s: (p * steps + s, 0)),
            ],
            out_specs=pl.BlockSpec((1, 4, tn), lambda p, s: (p, 0, 0)),
            scratch_shapes=[pltpu.VMEM((tm, tn), jnp.float32)] * 4,
        ),
        compiler_params=pltpu.CompilerParams(
            # Outer split is independent -> megacore-parallel on v7x;
            # inner axis is the running reduction (resident output/scratch).
            dimension_semantics=("parallel", "arbitrary"),
        ),
    )(x2, t2)

    # Exact integer finalization: partial values are integer-valued and small
    # enough to be exact in f32; cast to i32 and finish the reduce exactly.
    counts = jnp.sum(partials.astype(jnp.int32), axis=(0, 2))   # (4,) tiny XLA reduce
    n_t = counts[0]                                  # count_nonzero(target)
    n_x = counts[1]                                  # count_nonzero(logits)
    n_i = counts[2]                                  # count_nonzero(logits & target)
    n_c = counts[3] - pad                            # count_nonzero(logits != 1)

    n_t_f = n_t.astype(jnp.float32)
    n_x_f = n_x.astype(jnp.float32)
    n_i_f = n_i.astype(jnp.float32)
    n_c_f = n_c.astype(jnp.float32)
    total = jnp.float32(n)

    target_empty = n_t == 0
    # empty-target branch: target+1 -> all nonzero, logits -> 1-logits
    inter = jnp.where(target_empty, n_c_f, n_i_f)
    denom = jnp.where(target_empty, n_c_f + total, n_x_f + n_t_f)
    safe = jnp.where(denom > 0, denom, jnp.float32(1.0))
    return jnp.where(denom > 0, 2.0 * inter / safe, jnp.float32(0.0))


def _reference_dice(logits, target):
    """Pure-JAX reference matching the PyTorch forward semantics."""
    l = jnp.asarray(logits, jnp.float32)
    t = jnp.asarray(target, jnp.float32)
    target_empty = jnp.count_nonzero(t) == 0
    l = jnp.where(target_empty, 1.0 - l, l)
    t = jnp.where(target_empty, t + 1.0, t)
    r = l != 0
    g = t != 0
    inter = jnp.sum(r & g).astype(jnp.float32)
    denom = (jnp.sum(r) + jnp.sum(g)).astype(jnp.float32)
    safe = jnp.where(denom > 0, denom, 1.0)
    return jnp.where(denom > 0, 2.0 * inter / safe, 0.0)


if __name__ == "__main__":
    key = jax.random.PRNGKey(0)
    k1, k2, k3 = jax.random.split(key, 3)

    B, C, H, W = 2, 4, 16, 16

    # Case 1: normal branch (target has foreground).
    pred = (jax.random.uniform(k1, (B, C, H, W)) > 0.5).astype(jnp.float32)
    targ = (jax.random.uniform(k2, (B, C, H, W)) > 0.5).astype(jnp.float32)
    out1 = jax.block_until_ready(dice_coeff(pred, targ))
    ref1 = _reference_dice(pred, targ)
    assert jnp.allclose(out1, ref1, rtol=1e-6, atol=1e-6), (out1, ref1)

    # Case 2: empty-target branch (target all zeros -> inputs flipped).
    pred2 = (jax.random.uniform(k3, (B, C, H, W)) > 0.7).astype(jnp.float32)
    targ2 = jnp.zeros((B, C, H, W), jnp.float32)
    out2 = jax.block_until_ready(dice_coeff(pred2, targ2))
    ref2 = _reference_dice(pred2, targ2)
    assert jnp.allclose(out2, ref2, rtol=1e-6, atol=1e-6), (out2, ref2)

    print("KERNEL_OK")
</pallas_src>

<mosaic_0001>
module attributes {stable_mosaic.version = 11 : i64} {
  func.func @_dice_partials_kernel(%arg0: i32, %arg1: i32, %arg2: memref<8x512xf32, #tpu.memory_space<vmem>>, %arg3: memref<8x512xf32, #tpu.memory_space<vmem>>, %arg4: memref<1x4x512xf32, #tpu.memory_space<vmem>>, %arg5: memref<8x512xf32, #tpu.memory_space<vmem>>, %arg6: memref<8x512xf32, #tpu.memory_space<vmem>>, %arg7: memref<8x512xf32, #tpu.memory_space<vmem>>, %arg8: memref<8x512xf32, #tpu.memory_space<vmem>>) attributes {dimension_semantics = [#tpu.dimension_semantics<parallel>, #tpu.dimension_semantics<arbitrary>], iteration_bounds = array<i64: 2, 1>, scalar_prefetch = 0 : i64, scratch_operands = 4 : i64, tpu.core_type = #tpu.core_type<tc>, window_params = [{transform_indices = @transform_0, window_bounds = array<i64: 8, 512>}, {transform_indices = @transform_1, window_bounds = array<i64: 8, 512>}, {transform_indices = @transform_2, window_bounds = array<i64: 1, 4, 512>}]} {
    %c0_i32 = arith.constant 0 : i32
    %0 = arith.cmpi eq, %arg1, %c0_i32 : i32
    %1 = arith.extui %0 : i1 to i32
    %c0_i32_0 = arith.constant 0 : i32
    %2 = arith.cmpi ne, %1, %c0_i32_0 : i32
    scf.if %2 {
      %cst_24 = arith.constant 0.000000e+00 : f32
      %33 = vector.broadcast %cst_24 : f32 to vector<8x512xf32>
      %c0_25 = arith.constant 0 : index
      %c0_26 = arith.constant 0 : index
      %34 = vector.load %arg5[%c0_25, %c0_26] : memref<8x512xf32, #tpu.memory_space<vmem>>, vector<8x512xf32>
      tpu.vector_store %arg5[%c0_25, %c0_26], %33 {strides = array<i32>} : memref<8x512xf32, #tpu.memory_space<vmem>>, vector<8x512xf32>,
      %cst_27 = arith.constant 0.000000e+00 : f32
      %35 = vector.broadcast %cst_27 : f32 to vector<8x512xf32>
      %c0_28 = arith.constant 0 : index
      %c0_29 = arith.constant 0 : index
      %36 = vector.load %arg6[%c0_28, %c0_29] : memref<8x512xf32, #tpu.memory_space<vmem>>, vector<8x512xf32>
      tpu.vector_store %arg6[%c0_28, %c0_29], %35 {strides = array<i32>} : memref<8x512xf32, #tpu.memory_space<vmem>>, vector<8x512xf32>,
      %cst_30 = arith.constant 0.000000e+00 : f32
      %37 = vector.broadcast %cst_30 : f32 to vector<8x512xf32>
      %c0_31 = arith.constant 0 : index
      %c0_32 = arith.constant 0 : index
      %38 = vector.load %arg7[%c0_31, %c0_32] : memref<8x512xf32, #tpu.memory_space<vmem>>, vector<8x512xf32>
      tpu.vector_store %arg7[%c0_31, %c0_32], %37 {strides = array<i32>} : memref<8x512xf32, #tpu.memory_space<vmem>>, vector<8x512xf32>,
      %cst_33 = arith.constant 0.000000e+00 : f32
      %39 = vector.broadcast %cst_33 : f32 to vector<8x512xf32>
      %c0_34 = arith.constant 0 : index
      %c0_35 = arith.constant 0 : index
      %40 = vector.load %arg8[%c0_34, %c0_35] : memref<8x512xf32, #tpu.memory_space<vmem>>, vector<8x512xf32>
      tpu.vector_store %arg8[%c0_34, %c0_35], %39 {strides = array<i32>} : memref<8x512xf32, #tpu.memory_space<vmem>>, vector<8x512xf32>,
    } else {
    }
    %c0 = arith.constant 0 : index
    %c0_1 = arith.constant 0 : index
    %3 = vector.load %arg2[%c0, %c0_1] : memref<8x512xf32, #tpu.memory_space<vmem>>, vector<8x512xf32>
    %c0_2 = arith.constant 0 : index
    %c0_3 = arith.constant 0 : index
    %4 = vector.load %arg3[%c0_2, %c0_3] : memref<8x512xf32, #tpu.memory_space<vmem>>, vector<8x512xf32>
    %cst = arith.constant 0.000000e+00 : f32
    %5 = vector.broadcast %cst : f32 to vector<8x512xf32>
    %6 = arith.cmpf one, %4, %5 : vector<8x512xf32>
    %7 = arith.extui %6 : vector<8x512xi1> to vector<8x512xi32>
    %8 = arith.sitofp %7 : vector<8x512xi32> to vector<8x512xf32>
    %cst_4 = arith.constant 0.000000e+00 : f32
    %9 = vector.broadcast %cst_4 : f32 to vector<8x512xf32>
    %10 = arith.cmpf one, %3, %9 : vector<8x512xf32>
    %11 = arith.extui %10 : vector<8x512xi1> to vector<8x512xi32>
    %12 = arith.sitofp %11 : vector<8x512xi32> to vector<8x512xf32>
    %cst_5 = arith.constant 1.000000e+00 : f32
    %13 = vector.broadcast %cst_5 : f32 to vector<8x512xf32>
    %14 = arith.cmpf one, %3, %13 : vector<8x512xf32>
    %15 = arith.extui %14 : vector<8x512xi1> to vector<8x512xi32>
    %16 = arith.sitofp %15 : vector<8x512xi32> to vector<8x512xf32>
    %c0_6 = arith.constant 0 : index
    %c0_7 = arith.constant 0 : index
    %17 = vector.load %arg5[%c0_6, %c0_7] : memref<8x512xf32, #tpu.memory_space<vmem>>, vector<8x512xf32>
    %18 = arith.addf %17, %8 : vector<8x512xf32>
    %c0_8 = arith.constant 0 : index
    %c0_9 = arith.constant 0 : index
    %19 = vector.load %arg5[%c0_8, %c0_9] : memref<8x512xf32, #tpu.memory_space<vmem>>, vector<8x512xf32>
    tpu.vector_store %arg5[%c0_8, %c0_9], %18 {strides = array<i32>} : memref<8x512xf32, #tpu.memory_space<vmem>>, vector<8x512xf32>,
    %c0_10 = arith.constant 0 : index
    %c0_11 = arith.constant 0 : index
    %20 = vector.load %arg6[%c0_10, %c0_11] : memref<8x512xf32, #tpu.memory_space<vmem>>, vector<8x512xf32>
    %21 = arith.addf %20, %12 : vector<8x512xf32>
    %c0_12 = arith.constant 0 : index
    %c0_13 = arith.constant 0 : index
    %22 = vector.load %arg6[%c0_12, %c0_13] : memref<8x512xf32, #tpu.memory_space<vmem>>, vector<8x512xf32>
    tpu.vector_store %arg6[%c0_12, %c0_13], %21 {strides = array<i32>} : memref<8x512xf32, #tpu.memory_space<vmem>>, vector<8x512xf32>,
    %c0_14 = arith.constant 0 : index
    %c0_15 = arith.constant 0 : index
    %23 = vector.load %arg7[%c0_14, %c0_15] : memref<8x512xf32, #tpu.memory_space<vmem>>, vector<8x512xf32>
    %24 = arith.mulf %8, %12 : vector<8x512xf32>
    %25 = arith.addf %23, %24 : vector<8x512xf32>
    %c0_16 = arith.constant 0 : index
    %c0_17 = arith.constant 0 : index
    %26 = vector.load %arg7[%c0_16, %c0_17] : memref<8x512xf32, #tpu.memory_space<vmem>>, vector<8x512xf32>
    tpu.vector_store %arg7[%c0_16, %c0_17], %25 {strides = array<i32>} : memref<8x512xf32, #tpu.memory_space<vmem>>, vector<8x512xf32>,
    %c0_18 = arith.constant 0 : index
    %c0_19 = arith.constant 0 : index
    %27 = vector.load %arg8[%c0_18, %c0_19] : memref<8x512xf32, #tpu.memory_space<vmem>>, vector<8x512xf32>
    %28 = arith.addf %27, %16 : vector<8x512xf32>
    %c0_20 = arith.constant 0 : index
    %c0_21 = arith.constant 0 : index
    %29 = vector.load %arg8[%c0_20, %c0_21] : memref<8x512xf32, #tpu.memory_space<vmem>>, vector<8x512xf32>
    tpu.vector_store %arg8[%c0_20, %c0_21], %28 {strides = array<i32>} : memref<8x512xf32, #tpu.memory_space<vmem>>, vector<8x512xf32>,
    %c0_i32_22 = arith.constant 0 : i32
    %30 = arith.cmpi eq, %arg1, %c0_i32_22 : i32
    %31 = arith.extui %30 : i1 to i32
    %c0_i32_23 = arith.constant 0 : i32
    %32 = arith.cmpi ne, %31, %c0_i32_23 : i32
    scf.if %32 {
      %c0_24 = arith.constant 0 : index
      %c0_25 = arith.constant 0 : index
      %33 = vector.load %arg5[%c0_24, %c0_25] : memref<8x512xf32, #tpu.memory_space<vmem>>, vector<8x512xf32>
      %cst_26 = arith.constant dense<0.000000e+00> : vector<512xf32>
      %34 = vector.multi_reduction <add>, %33, %cst_26 [0] : vector<8x512xf32> to vector<512xf32>
      %35 = vector.shape_cast %34 : vector<512xf32> to vector<1x512xf32>
      %36 = vector.shape_cast %35 : vector<1x512xf32> to vector<1x1x512xf32>
      %c0_27 = arith.constant 0 : index
      %c0_28 = arith.constant 0 : index
      %c0_29 = arith.constant 0 : index
      %37 = vector.load %arg4[%c0_27, %c0_28, %c0_29] : memref<1x4x512xf32, #tpu.memory_space<vmem>>, vector<1x1x512xf32>
      tpu.vector_store %arg4[%c0_27, %c0_28, %c0_29], %36 {strides = array<i32>} : memref<1x4x512xf32, #tpu.memory_space<vmem>>, vector<1x1x512xf32>,
      %c0_30 = arith.constant 0 : index
      %c0_31 = arith.constant 0 : index
      %38 = vector.load %arg6[%c0_30, %c0_31] : memref<8x512xf32, #tpu.memory_space<vmem>>, vector<8x512xf32>
      %cst_32 = arith.constant dense<0.000000e+00> : vector<512xf32>
      %39 = vector.multi_reduction <add>, %38, %cst_32 [0] : vector<8x512xf32> to vector<512xf32>
      %40 = vector.shape_cast %39 : vector<512xf32> to vector<1x512xf32>
      %41 = vector.shape_cast %40 : vector<1x512xf32> to vector<1x1x512xf32>
      %c0_33 = arith.constant 0 : index
      %c1 = arith.constant 1 : index
      %c0_34 = arith.constant 0 : index
      %42 = vector.load %arg4[%c0_33, %c1, %c0_34] : memref<1x4x512xf32, #tpu.memory_space<vmem>>, vector<1x1x512xf32>
      tpu.vector_store %arg4[%c0_33, %c1, %c0_34], %41 {strides = array<i32>} : memref<1x4x512xf32, #tpu.memory_space<vmem>>, vector<1x1x512xf32>,
      %c0_35 = arith.constant 0 : index
      %c0_36 = arith.constant 0 : index
      %43 = vector.load %arg7[%c0_35, %c0_36] : memref<8x512xf32, #tpu.memory_space<vmem>>, vector<8x512xf32>
      %cst_37 = arith.constant dense<0.000000e+00> : vector<512xf32>
      %44 = vector.multi_reduction <add>, %43, %cst_37 [0] : vector<8x512xf32> to vector<512xf32>
      %45 = vector.shape_cast %44 : vector<512xf32> to vector<1x512xf32>
      %46 = vector.shape_cast %45 : vector<1x512xf32> to vector<1x1x512xf32>
      %c0_38 = arith.constant 0 : index
      %c2 = arith.constant 2 : index
      %c0_39 = arith.constant 0 : index
      %47 = vector.load %arg4[%c0_38, %c2, %c0_39] : memref<1x4x512xf32, #tpu.memory_space<vmem>>, vector<1x1x512xf32>
      tpu.vector_store %arg4[%c0_38, %c2, %c0_39], %46 {strides = array<i32>} : memref<1x4x512xf32, #tpu.memory_space<vmem>>, vector<1x1x512xf32>,
      %c0_40 = arith.constant 0 : index
      %c0_41 = arith.constant 0 : index
      %48 = vector.load %arg8[%c0_40, %c0_41] : memref<8x512xf32, #tpu.memory_space<vmem>>, vector<8x512xf32>
      %cst_42 = arith.constant dense<0.000000e+00> : vector<512xf32>
      %49 = vector.multi_reduction <add>, %48, %cst_42 [0] : vector<8x512xf32> to vector<512xf32>
      %50 = vector.shape_cast %49 : vector<512xf32> to vector<1x512xf32>
      %51 = vector.shape_cast %50 : vector<1x512xf32> to vector<1x1x512xf32>
      %c0_43 = arith.constant 0 : index
      %c3 = arith.constant 3 : index
      %c0_44 = arith.constant 0 : index
      %52 = vector.load %arg4[%c0_43, %c3, %c0_44] : memref<1x4x512xf32, #tpu.memory_space<vmem>>, vector<1x1x512xf32>
      tpu.vector_store %arg4[%c0_43, %c3, %c0_44], %51 {strides = array<i32>} : memref<1x4x512xf32, #tpu.memory_space<vmem>>, vector<1x1x512xf32>,
    } else {
    }
    return
  }
  func.func @transform_0(%arg0: i32, %arg1: i32) -> (i32, i32) {
    %c1_i32 = arith.constant 1 : i32
    %0 = arith.muli %arg0, %c1_i32 : i32
    %1 = arith.addi %0, %arg1 : i32
    %c0_i32 = arith.constant 0 : i32
    %c0_i32_0 = arith.constant 0 : i32
    return %1, %c0_i32 : i32, i32
  }
  func.func @transform_1(%arg0: i32, %arg1: i32) -> (i32, i32) {
    %c1_i32 = arith.constant 1 : i32
    %0 = arith.muli %arg0, %c1_i32 : i32
    %1 = arith.addi %0, %arg1 : i32
    %c0_i32 = arith.constant 0 : i32
    %c0_i32_0 = arith.constant 0 : i32
    return %1, %c0_i32 : i32, i32
  }
  func.func @transform_2(%arg0: i32, %arg1: i32) -> (i32, i32, i32) {
    %c0_i32 = arith.constant 0 : i32
    %c0_i32_0 = arith.constant 0 : i32
    %c0_i32_1 = arith.constant 0 : i32
    return %arg0, %c0_i32, %c0_i32_0 : i32, i32, i32
  }
}

</mosaic_0001>

<bundles_post_ra>
// kernel: tpu_custom_call.1
= control target key start
LH: loop header
LB: loop body
LE: loop exit
PB: predicated region body
PF: predicated region fallthrough
CT: control target
= control target key end

     0   :  { %7 = vsyncpa [#allocation7], 0  ;;  %s1256_s0 = inlined_call_operand.hbm [shape: f32[16,512], index: 0, kind: input, shape index: {}]   ;;  %s1257_s1 = inlined_call_operand.hbm [shape: f32[16,512], index: 1, kind: input, shape index: {}]   ;;  %s1258_s2 = inlined_call_operand.hbm [shape: f32[2,4,512], index: 2, kind: output, shape index: {}]  }
   0x1   :  { %9 = vsyncpa [#allocation7 + $0x1], 0 }
   0x2   :  { %10 = vsyncpa [#allocation10], 0 }
   0x3   :  { %12 = vsyncpa [#allocation10 + $0x1], 0 }
   0x4   :  { %13 = vsyncpa [#allocation8], 0 }
   0x5   :  { %15 = vsyncpa [#allocation8 + $0x1], 0  ;;  %s968_s9 = smov 0   ;;  %s970_s10 = smov 0  }
   0x6   :  { %s972_s11 = smov 0   ;;  %s974_s12 = smov 0  }
   0x7   :  { %s976_s13 = smov 0   ;;  %s978_s14 = smov 0  }
   0x8 LB: > { %s694_s15 = sadd.s32 4294967295, %s946_s14   ;;  %s695_s16 = sadd.s32 4294967294, %s946_s14   ;;  %s946_s14 = sphi %s978_s14, %s21_s14   ;;  %s942_s13 = sphi %s976_s13, %s1280_s13   ;;  %s938_s12 = sphi %s974_s12, %s1279_s12   ;;  %s934_s11 = sphi %s972_s11, %s1278_s11   ;;  %s930_s10 = sphi %s970_s10, %s1277_s10   ;;  %s926_s9 = sphi %s968_s9, %s1276_s9  }
   0x9   : > { %s33_s17 = sadd.s32 1, %s942_s13  ;;  %s42_s18 = sadd.s32 1, %s934_s11 }
   0xa   : > { %p35_p0 = scmp.ge.s32.totalorder %s33_s17, 2  ;;  %p49_p1 = scmp.ne.s32.totalorder %s934_s11, %s930_s10 }
   0xb   : > { %p50_p2 = scmp.eq.s32.totalorder %s946_s14, 0  ;;  %p55_p3 = scmp.ne.s32.totalorder %s930_s10, %s926_s9 }
   0xc   : > { %s1282_s17 = smov (%p35_p0, %s33_s17), 0  ;;  %p56_p5 = scmp.eq.s32.totalorder %s694_s15, 0 }
   0xd   : > { %p1009_p4 = por %p50_p2, %p49_p1  ;;  %s39_s20 = ssub.s32 %s942_s13, %s1282_s17 }
   0xe   : > { %p107_p6 = scmp.eq.s32.totalorder %s694_s15, 1  ;;  %p40_p7 = scmp.eq.s32.totalorder %s39_s20, 0 }
   0xf   : > { %p1015_p8 = por %p56_p5, %p55_p3  ;;  %p113_p10 = scmp.eq.s32.totalorder %s695_s16, 1 }
  0x10   : > { %p1019_p9 = por %p107_p6, %p49_p1  ;;  %p748_p13 = scmp.lt.s32.totalorder %s946_s14, 2 }
  0x11   : > { %s1262_s21 = scalar_select %p1015_p8, 1, 0 }
  0x12   : > { %s1263_s22 = scalar_select %p1019_p9, 1, 0 }
  0x13   : > { %s1024_s23 = scalar_select %p40_p7, %s934_s11, %s42_s18  }
  0x14   : > { %p1026_p11 = por %p113_p10, %p55_p3  ;;  %s1033_s25 = sand.u32 1, %s934_s11  }
  0x15   : > { %s698_s26 = sshll.u32 %s1033_s25, 5  ;;  %s728_s27 = sshll.u32 %s942_s13, 9 }
  0x16   : > { %s1264_s24 = scalar_select %p1026_p11, 1, 0 }
  0x17   : > { %s1042_s30 = scalar_lea.hbm %s1256_s0, %s728_s27  ;;  %s137_s3 = scalar_lea.vmem [#allocation6], %s698_s26 }
  0x18   : > { %s146_s4 = sshll.u32 %s137_s3, 4  ;;  %p1050_p0 = pnand %p748_p13, %p1009_p4  ;;  %s1046_s4 = int_to_ptr.vmem [resolvable:$true] %s146_s4 }
  0x19   : > { %s134_s6 = scalar_lea.sflag [#allocation7], %s1033_s25  ;;  %s800_s7 = scalar_lea.hbm %s1042_s30, 512 }
  0x1a   : > { %p801_p3 = scmp.ne.s32.totalorder %s1042_s30, %s800_s7  ;;  %p802_p5 = pneg %p1050_p0 }
  0x1b   : > { %s805_s16 = scalar_lea.hbm %s1256_s0, 1024  ;;  %p806_p4 = scmp.lt.u32.totalorder %s1042_s30, %s1256_s0 }
  0x1c   : > { %p803_p6 = pnand %p802_p5, %p801_p3  ;;  %p807_p10 = scmp.lt.u32.totalorder %s805_s16, %s800_s7 }
  0x1d   : > { %p809_p12 = scmp.lt.u32.totalorder %s800_s7, %s1042_s30 }
  0x1e   : > { %p804_p7 = pneg %p803_p6  ;;  %p808_p13 = por %p807_p10, %p806_p4 }
  0x20   : > { %p810_p1 = por %p809_p12, %p808_p13 }
  0x22   : > { %p811_p2 = pnand %p810_p1, %p804_p7 }
  0x24   : > { %814 = shalt.err (!%p811_p2)
}
  0x25   : > { %s815_s20 = scalar_lea.vmem %s1046_s4, 512  ;;  %s948_s28 = smov [#allocation6]  }
  0x26   : > { %p816_p3 = scmp.ne.s32.totalorder %s1046_s4, %s815_s20  ;;  %s820_s29 = sshll.u32 %s948_s28, 4  ;;  %s821_s29 = int_to_ptr.vmem [resolvable:$false] %s820_s29 }
  0x27   : > { %s822_s3 = scalar_lea.vmem %s821_s29, 1024  ;;  %p823_p9 = scmp.lt.s32.totalorder %s1046_s4, %s821_s29 }
  0x28   : > { %p818_p6 = pnand %p816_p3, %p802_p5  ;;  %p824_p4 = scmp.lt.s32.totalorder %s822_s3, %s815_s20 }
  0x2a   : > { %p819_p11 = pneg %p818_p6  ;;  %p825_p10 = por %p824_p4, %p823_p9 }
  0x2c   : > { %p826_p12 = pnand %p825_p10, %p819_p11 }
  0x2e   : > { %829 = shalt.err (!%p826_p12)
}
  0x2f   : > { %740 = dma.hbm_to_vmem [thread:$0]  (!%p1050_p0), %s1042_s30, 512, %s1046_s4, %s134_s6  }
  0x30   : > { %p1266_p1 = scmp.lt.s32.totalorder %s946_s14, 3  ;;  %p1267_p2 = scmp.ge.s32.totalorder %s946_s14, 1 }
  0x31   : > { %s1095_s16 = scalar_lea.hbm %s1257_s1, %s728_s27  ;;  %s157_s18 = scalar_lea.vmem [#allocation9], %s698_s26 }
  0x32   : > { %p1086_p7 = pnand %p1267_p2, %p1266_p1  ;;  %s166_s19 = sshll.u32 %s157_s18, 4  ;;  %s167_s19 = int_to_ptr.vmem [resolvable:$true] %s166_s19 }
  0x33   : > { %s154_s30 = scalar_lea.sflag [#allocation10], %s1033_s25  ;;  %s830_s4 = scalar_lea.hbm %s1095_s16, 512 }
  0x34   : > { %s1268_s7 = scalar_select %p1086_p7, 1, 0 }
  0x35   : > { %p831_p9 = scmp.ne.s32.totalorder %s1095_s16, %s830_s4  ;;  %s835_s27 = scalar_lea.hbm %s1257_s1, 1024 }
  0x36   : > { %p836_p3 = scmp.lt.u32.totalorder %s1095_s16, %s1257_s1  ;;  %p837_p6 = scmp.lt.u32.totalorder %s835_s27, %s830_s4 }
  0x37   : > { %p833_p11 = pnand %p831_p9, %p802_p5  ;;  %p839_p10 = scmp.lt.u32.totalorder %s830_s4, %s1095_s16 }
  0x38   : > { %p838_p4 = por %p837_p6, %p836_p3 }
  0x39   : > { %p834_p13 = pneg %p833_p11 }
  0x3a   : > { %p840_p12 = por %p839_p10, %p838_p4 }
  0x3c   : > { %p841_p1 = pnand %p840_p12, %p834_p13 }
  0x3e   : > { %844 = shalt.err (!%p841_p1)
}
  0x3f   : > { %s845_s25 = scalar_lea.vmem %s167_s19, 512  ;;  %s949_s26 = smov [#allocation9]  }
  0x40   : > { %p846_p2 = scmp.ne.s32.totalorder %s167_s19, %s845_s25  ;;  %s850_s3 = sshll.u32 %s949_s26, 4  ;;  %s851_s3 = int_to_ptr.vmem [resolvable:$false] %s850_s3 }
  0x41   : > { %s852_s8 = scalar_lea.vmem %s851_s3, 1024  ;;  %p853_p8 = scmp.lt.s32.totalorder %s167_s19, %s851_s3 }
  0x42   : > { %p848_p9 = pnand %p846_p2, %p802_p5  ;;  %p854_p7 = scmp.lt.s32.totalorder %s852_s8, %s845_s25 }
  0x44   : > { %p849_p11 = pneg %p848_p9  ;;  %p855_p3 = por %p854_p7, %p853_p8 }
  0x46   : > { %p856_p6 = pnand %p855_p3, %p849_p11 }
  0x48   : > { %859 = shalt.err (!%p856_p6)
}
  0x49   : > { %743 = dma.hbm_to_vmem [thread:$0]  (!%p1050_p0), %s1095_s16, 512, %s167_s19, %s154_s30  }
  0x4a   : > { %p1269_p13 = scmp.ne.s32.totalorder %s1268_s7, 0 }
  0x4b   : > { %s1122_s15 = sand.u32 (!%p1269_p13), 1, %s930_s10   ;;  %p1270_p5 = scmp.ne.s32.totalorder (!%p1269_p13), %s1262_s21, 0 }
  0x4c   : > { %175 = sbr.rel (%p1269_p13) target bundleno = 151 (0x97), region = 28  ;;  %s705_s18 = sshll.u32 (!%p1269_p13), %s1122_s15, 5 }
  0x4d   : > { %s178_s4 = scalar_lea.sflag (!%p1269_p13), [#allocation7], %s1122_s15  ;;  %s181_s6 = scalar_lea.vmem (!%p1269_p13), [#allocation6], %s705_s18 }
  0x53   : > { %913 = dma.done.wait (%p1270_p5), %s178_s4, 512  }
  0x54   : > { %915 = vsyncadd (%p1270_p5), %s178_s4, 4294966784  ;;  %s187_s5 = scalar_lea.sflag [#allocation10], %s1122_s15  ;;  %s190_s16 = scalar_lea.vmem [#allocation9], %s705_s18 }
  0x55   : > { %917 = dma.done.wait (%p1270_p5), %s187_s5, 512  }
  0x56   : > { %919 = vsyncadd (%p1270_p5), %s187_s5, 4294966784  ;;  %v374_v0 = vlaneseq  ;;  %v950_v1 = vmov 1966171168   ;;  %v242_v5 = vld [vmem:[%s190_s16] sm:$0xff]  ;;  %v243_v6 = vld [vmem:[%s190_s16 + $0x8] sm:$0xff]  ;;  %v951_v12 = vmov 0.0  }
  0x57   : > { %v372_v2 = vunpack.c.l.s4 %v950_v1  ;;  %v244_v7 = vld [vmem:[%s190_s16 + $0x10] sm:$0xff]  ;;  %v245_v8 = vld [vmem:[%s190_s16 + $0x18] sm:$0xff]  ;;  %vm246_vm0 = vcmp.ne.f32.partialorder %v242_v5, 0.0  ;;  %vm247_vm1 = vcmp.ne.f32.partialorder %v243_v6, 0.0  ;;  %v1138_v10 = vld [vmem:[%s181_s6] sm:$0xff]  ;;  %s707_s21 = sshll.u32 %s1122_s15, 4 }
  0x58   : > { %v375_v4 = vshrl.u32 %v374_v0, 7  ;;  %vm248_vm2 = vcmp.ne.f32.partialorder %v244_v7, 0.0  ;;  %v1140_v11 = vld [vmem:[%s181_s6 + $0x8] sm:$0xff]  ;;  %vm249_vm3 = vcmp.ne.f32.partialorder %v245_v8, 0.0  ;;  %v708_v13 = vsel %vm246_vm0, 1.0, %v951_v12  ;;  %v1145_v16 = vld [vmem:[%s181_s6 + $0x10] sm:$0xff] }
  0x59   : > { %v373_v3 = vunpack.c.0.s8 %v372_v2  ;;  %v709_v14 = vsel %vm247_vm1, 1.0, %v951_v12  ;;  %v710_v15 = vsel %vm248_vm2, 1.0, %v951_v12  ;;  %v1147_v17 = vld [vmem:[%s181_s6 + $0x18] sm:$0xff]  ;;  %v711_v18 = vsel %vm249_vm3, 1.0, %v951_v12  ;;  %s1171_s7 = scalar_lea.vmem [#allocation11], %s707_s21  ;;  %s730_s30 = sshll.u32 %s938_s12, 8 }
  0x5a   : > { %v341_v19 = vrot.slane %v708_v13, 4  ;;  %v347_v20 = vrot.slane %v709_v14, 4  ;;  %v353_v21 = vrot.slane %v710_v15, 4  ;;  %v359_v22 = vrot.slane %v711_v18, 4  ;;  %s591_s19 = sshll.u32 %s1171_s7, 4  ;;  %s1206_s28 = scalar_lea.hbm %s1258_s2, %s730_s30  ;;  %s1200_s19 = int_to_ptr.vmem [resolvable:$true] %s591_s19 }
  0x5b   : > { %v1136_v9 = vsub.s32 %v373_v3, %v375_v4  ;;  %vm258_vm4 = vcmp.ne.f32.partialorder %v1138_v10, 0.0  ;;  %vm259_vm5 = vcmp.ne.f32.partialorder %v1140_v11, 0.0  ;;  %vm260_vm6 = vcmp.ne.f32.partialorder %v1145_v16, 0.0  ;;  %s577_s29 = scalar_lea.sflag [#allocation8], %s1122_s15  ;;  %s860_s25 = scalar_lea.vmem %s1200_s19, 256 }
  0x5c   : > { %v342_v23 = vadd.f32 %v708_v13, %v341_v19  ;;  %v348_v24 = vadd.f32 %v709_v14, %v347_v20  ;;  %v354_v25 = vadd.f32 %v710_v15, %v353_v21  ;;  %vm261_vm7 = vcmp.ne.f32.partialorder %v1147_v17, 0.0  ;;  %p861_p8 = scmp.ne.s32.totalorder %s1200_s19, %s860_s25  ;;  %p1273_p0 = scmp.ne.s32.totalorder %s1263_s22, 0 }
  0x5d   : > { %v360_v26 = vadd.f32 %v711_v18, %v359_v22  ;;  %v712_v27 = vsel %vm258_vm4, 1.0, %v951_v12  ;;  %v713_v28 = vsel %vm259_vm5, 1.0, %v951_v12  ;;  %v714_v29 = vsel %vm260_vm6, 1.0, %v951_v12  ;;  %s952_s12 = smov [#allocation11]  }
  0x5e   : > { %v343_v30 = vrot.slane %v342_v23, 2  ;;  %v349_v31 = vrot.slane %v348_v24, 2  ;;  %v355_v32 = vrot.slane %v354_v25, 2  ;;  %v715_v33 = vsel %vm261_vm7, 1.0, %v951_v12  ;;  %p862_p7 = pnand %p861_p8, %p1273_p0  ;;  %s864_s26 = sshll.u32 %s952_s12, 4  ;;  %s865_s26 = int_to_ptr.vmem [resolvable:$false] %s864_s26 }
  0x5f   : > { %v361_v34 = vrot.slane %v360_v26, 2  ;;  %v403_v35 = vrot.slane %v712_v27, 4  ;;  %v409_v36 = vrot.slane %v713_v28, 4  ;;  %v415_v37 = vrot.slane %v714_v29, 4  ;;  %s866_s3 = scalar_lea.vmem %s865_s26, 512  ;;  %p867_p10 = scmp.lt.s32.totalorder %s1200_s19, %s865_s26 }
  0x60   : > { %v344_v38 = vadd.f32 %v343_v30, %v342_v23  ;;  %v350_v39 = vadd.f32 %v349_v31, %v348_v24  ;;  %v356_v40 = vadd.f32 %v355_v32, %v354_v25  ;;  %v421_v41 = vrot.slane %v715_v33, 4  ;;  %p863_p4 = pneg %p862_p7  ;;  %p868_p12 = scmp.lt.s32.totalorder %s866_s3, %s860_s25 }
  0x61   : > { %v362_v42 = vadd.f32 %v361_v34, %v360_v26  ;;  %v404_v43 = vadd.f32 %v712_v27, %v403_v35  ;;  %v410_v44 = vadd.f32 %v713_v28, %v409_v36  ;;  %v416_v45 = vadd.f32 %v714_v29, %v415_v37 }
  0x62   : > { %v345_v46 = vrot.slane %v344_v38, 1  ;;  %v351_v47 = vrot.slane %v350_v39, 1  ;;  %v357_v48 = vrot.slane %v356_v40, 1  ;;  %v422_v49 = vadd.f32 %v715_v33, %v421_v41  ;;  %p869_p1 = por %p868_p12, %p867_p10 }
  0x63   : > { %v363_v50 = vrot.slane %v362_v42, 1  ;;  %v405_v51 = vrot.slane %v404_v43, 2  ;;  %v411_v52 = vrot.slane %v410_v44, 2  ;;  %v417_v53 = vrot.slane %v416_v45, 2 }
  0x64   : > { %v346_v54 = vadd.f32 %v345_v46, %v344_v38  ;;  %v352_v55 = vadd.f32 %v351_v47, %v350_v39  ;;  %v358_v56 = vadd.f32 %v357_v48, %v356_v40  ;;  %vm1159_vm8 = vcmp.lt.s32.totalorder %v374_v0, 512  ;;  %p870_p2 = pnand %p869_p1, %p863_p4 }
  0x65   : > { %v423_v58 = vrot.slane %v422_v49, 2  ;;  %v364_v59 = vadd.f32 %v363_v50, %v362_v42  ;;  %v406_v60 = vadd.f32 %v405_v51, %v404_v43  ;;  %v412_v61 = vadd.f32 %v411_v52, %v410_v44 }
  0x66   : > { %v418_v62 = vadd.f32 %v417_v53, %v416_v45  ;;  %v369_v63 = vcombine.low %v346_v54, %v352_v55  ;;  %v310_v2 = vmul.f32 %v712_v27, %v708_v13  ;;  %v311_v3 = vmul.f32 %v713_v28, %v709_v14 }
  0x67   : > { %v424_v1 = vadd.f32 %v423_v58, %v422_v49  ;;  %v370_v4 = vcombine.low %v358_v56, %v364_v59  ;;  %v407_v5 = vrot.slane %v406_v60, 1  ;;  %v413_v6 = vrot.slane %v412_v61, 1 }
  0x68   : > { %v419_v7 = vrot.slane %v418_v62, 1  ;;  %v377_v8 = vrot.slane %v369_v63, %v1136_v9  ;;  %v312_v19 = vmul.f32 %v714_v29, %v710_v15  ;;  %v313_v20 = vmul.f32 %v715_v33, %v711_v18 }
  0x69   : > { %v425_v0 = vrot.slane %v424_v1, 1  ;;  %v384_v21 = vrot.slane %v370_v4, %v1136_v9  ;;  %v408_v22 = vadd.f32 %v407_v5, %v406_v60  ;;  %v414_v23 = vadd.f32 %v413_v6, %v412_v61 }
  0x6a   : > { %v420_v24 = vadd.f32 %v419_v7, %v418_v62  ;;  %v462_v26 = vrot.slane %v310_v2, 4  ;;  %v468_v30 = vrot.slane %v311_v3, 4  ;;  %v474_v13 = vrot.slane %v312_v19, 4 }
  0x6b   : > { %v426_v25 = vadd.f32 %v425_v0, %v424_v1  ;;  %v385_v14 = vcombine.low %v377_v8, %v384_v21  ;;  %v431_v27 = vcombine.low %v408_v22, %v414_v23  ;;  %v480_v28 = vrot.slane %v313_v20, 4 }
  0x6c   : > { %vm270_vm9 = vcmp.ne.f32.partialorder %v1138_v10, 1.0  ;;  %v463_v32 = vadd.f32 %v462_v26, %v310_v2  ;;  %v469_v34 = vadd.f32 %v468_v30, %v311_v3  ;;  %v475_v15 = vadd.f32 %v474_v13, %v312_v19 }
  0x6d   : > { %v432_v31 = vcombine.low %v420_v24, %v426_v25  ;;  %v392_v18 = vrot.slane %v385_v14, %v1136_v9  ;;  %v439_v29 = vrot.slane %v431_v27, %v1136_v9  ;;  %v481_v33 = vadd.f32 %v480_v28, %v313_v20 }
  0x6e   : > { %vm271_vm10 = vcmp.ne.f32.partialorder %v1140_v11, 1.0  ;;  %v464_v36 = vrot.slane %v463_v32, 2  ;;  %v470_v37 = vrot.slane %v469_v34, 2  ;;  %v476_v38 = vrot.slane %v475_v15, 2 }
  0x6f   : > { %v446_v35 = vrot.slane %v432_v31, %v1136_v9  ;;  %398 = vst.msk [vmem:[%s1171_s7] ss:$4 sm:$0xf] %vm1159_vm8, %v392_v18  ;;  %v482_v39 = vrot.slane %v481_v33, 2  ;;  %vm272_vm11 = vcmp.ne.f32.partialorder %v1145_v16, 1.0  ;;  %vm273_vm12 = vcmp.ne.f32.partialorder %v1147_v17, 1.0 }
  0x70   : > { %v716_v40 = vsel %vm270_vm9, 1.0, %v951_v12  ;;  %v465_v42 = vadd.f32 %v464_v36, %v463_v32  ;;  %v471_v43 = vadd.f32 %v470_v37, %v469_v34  ;;  %v477_v44 = vadd.f32 %v476_v38, %v475_v15 }
  0x71   : > { %v447_v41 = vcombine.low %v439_v29, %v446_v35  ;;  %v483_v45 = vadd.f32 %v482_v39, %v481_v33  ;;  %v717_v46 = vsel %vm271_vm10, 1.0, %v951_v12  ;;  %v718_v47 = vsel %vm272_vm11, 1.0, %v951_v12 }
  0x72   : > { %v719_v16 = vsel %vm273_vm12, 1.0, %v951_v12  ;;  %v466_v48 = vrot.slane %v465_v42, 1  ;;  %v472_v49 = vrot.slane %v471_v43, 1  ;;  %v478_v10 = vrot.slane %v477_v44, 1 }
  0x73   : > { %v454_v17 = vrot.slane %v447_v41, %v1136_v9  ;;  %v484_v50 = vrot.slane %v483_v45, 1  ;;  %v521_v51 = vrot.slane %v716_v40, 4  ;;  %v527_v52 = vrot.slane %v717_v46, 4 }
  0x74   : > { %v533_v53 = vrot.slane %v718_v47, 4  ;;  %v467_v54 = vadd.f32 %v466_v48, %v465_v42  ;;  %v473_v55 = vadd.f32 %v472_v49, %v471_v43  ;;  %v479_v11 = vadd.f32 %v478_v10, %v477_v44 }
  0x75   : > { %720 = vst.msk [vmem:[%s1171_s7 + $0x1] ss:$4 sm:$0xf] %vm1159_vm8, %v454_v17  ;;  %v539_v56 = vrot.slane %v719_v16, 4  ;;  %v485_v58 = vadd.f32 %v484_v50, %v483_v45  ;;  %v522_v59 = vadd.f32 %v716_v40, %v521_v51  ;;  %v528_v60 = vadd.f32 %v717_v46, %v527_v52 }
  0x76   : > { %v534_v12 = vadd.f32 %v718_v47, %v533_v53  ;;  %v490_v61 = vcombine.low %v467_v54, %v473_v55 }
  0x77   : > { %v540_v62 = vadd.f32 %v719_v16, %v539_v56  ;;  %v491_v63 = vcombine.low %v479_v11, %v485_v58  ;;  %v523_v1 = vrot.slane %v522_v59, 2  ;;  %v529_v2 = vrot.slane %v528_v60, 2 }
  0x78   : > { %v535_v3 = vrot.slane %v534_v12, 2  ;;  %v498_v4 = vrot.slane %v490_v61, %v1136_v9 }
  0x79   : > { %v541_v5 = vrot.slane %v540_v62, 2  ;;  %v505_v6 = vrot.slane %v491_v63, %v1136_v9  ;;  %v524_v7 = vadd.f32 %v523_v1, %v522_v59  ;;  %v530_v8 = vadd.f32 %v529_v2, %v528_v60 }
  0x7a   : > { %v536_v0 = vadd.f32 %v535_v3, %v534_v12 }
  0x7b   : > { %v542_v19 = vadd.f32 %v541_v5, %v540_v62  ;;  %v506_v20 = vcombine.low %v498_v4, %v505_v6  ;;  %v525_v21 = vrot.slane %v524_v7, 1  ;;  %v531_v22 = vrot.slane %v530_v8, 1 }
  0x7c   : > { %v537_v23 = vrot.slane %v536_v0, 1 }
  0x7d   : > { %v543_v24 = vrot.slane %v542_v19, 1  ;;  %v513_v25 = vrot.slane %v506_v20, %v1136_v9  ;;  %v526_v26 = vadd.f32 %v525_v21, %v524_v7  ;;  %v532_v30 = vadd.f32 %v531_v22, %v530_v8 }
  0x7e   : > { %v538_v13 = vadd.f32 %v537_v23, %v536_v0 }
  0x7f   : > { %v544_v14 = vadd.f32 %v543_v24, %v542_v19  ;;  %721 = vst.msk [vmem:[%s1171_s7 + $0x2] ss:$4 sm:$0xf] %vm1159_vm8, %v513_v25  ;;  %v549_v27 = vcombine.low %v526_v26, %v532_v30 }
  0x81   : > { %v550_v28 = vcombine.low %v538_v13, %v544_v14  ;;  %v557_v31 = vrot.slane %v549_v27, %v1136_v9 }
  0x83   : > { %v564_v32 = vrot.slane %v550_v28, %v1136_v9 }
  0x85   : > { %v565_v34 = vcombine.low %v557_v31, %v564_v32 }
  0x87   : > { %v572_v15 = vrot.slane %v565_v34, %v1136_v9 }
  0x89   : > { %722 = vst.msk [vmem:[%s1171_s7 + $0x3] ss:$4 sm:$0xf] %vm1159_vm8, %v572_v15 }
  0x8a   : > { %873 = shalt.err (!%p870_p2)
}
  0x8b   : > { %s874_s8 = scalar_lea.hbm %s1206_s28, 256  ;;  %s878_s4 = scalar_lea.hbm %s1258_s2, 512 }
  0x8c   : > { %p875_p9 = scmp.ne.s32.totalorder %s1206_s28, %s874_s8  ;;  %p879_p6 = scmp.lt.u32.totalorder %s1206_s28, %s1258_s2 }
  0x8d   : > { %p880_p13 = scmp.lt.u32.totalorder %s878_s4, %s874_s8  ;;  %p882_p8 = scmp.lt.u32.totalorder %s874_s8, %s1206_s28 }
  0x8e   : > { %p876_p11 = pnand %p875_p9, %p1273_p0 }
  0x8f   : > { %p881_p5 = por %p880_p13, %p879_p6 }
  0x90   : > { %p877_p3 = pneg %p876_p11 }
  0x91   : > { %p883_p7 = por %p882_p8, %p881_p5 }
  0x93   : > { %p884_p4 = pnand %p883_p7, %p877_p3 }
  0x95   : > { %887 = shalt.err (!%p884_p4)
}
  0x96   : > { %735 = dma.vmem_to_hbm [thread:$0]  (%p1273_p0), %s1200_s19, 256, %s1206_s28, %s577_s29  }
  0x97 PF: > { %s603_s16 = sand.u32 1, %s926_s9   ;;  %p1274_p10 = scmp.ne.s32.totalorder %s1264_s24, 0 }
  0x98   : > { %p1275_p12 = scmp.ge.s32.totalorder %s946_s14, 2  ;;  %s604_s21 = scalar_lea.sflag [#allocation8], %s603_s16 }
  0x9a   : > { %p745_p1 = pnand %p1275_p12, %p1274_p10 }
  0x9c   : > { %921 = dma.done.wait (!%p745_p1), %s604_s21, 256  }
  0x9d   : > { %923 = vsyncadd (!%p745_p1), %s604_s21, 4294967040  ;;  %s21_s14 = sadd.s32 1, %s946_s14   ;;  %s1276_s9 = smov %s930_s10 }
  0x9e   : > { %p18_p2 = scmp.ge.s32.totalorder %s21_s14, 4   ;;  %s1277_s10 = smov %s934_s11 }
  0x9f   : > { %s1278_s11 = smov %s1024_s23  ;;  %s1279_s12 = smov %s942_s13 }
  0xa0   : > { %s1280_s13 = smov %s1282_s17  ;;  %20 = sbr.rel (!%p18_p2) target bundleno = 8 (0x8), region = 97 }
  0xa7   :  { %609 = vsyncpa [#allocation7], 1 }
  0xa8   :  { %611 = vsyncpa [#allocation7 + $0x1], 1 }
  0xa9   :  { %612 = vsyncpa [#allocation10], 1 }
  0xaa   :  { %614 = vsyncpa [#allocation10 + $0x1], 1 }
  0xab   :  { %615 = vsyncpa [#allocation8], 1 }
  0xac   :  { %617 = vsyncpa [#allocation8 + $0x1], 1 }

</bundles_post_ra>
